<compile_context>
chip_gen: v7x
topology: tpu7x:2x2x1
jax: 0.10.0
libtpu: 0.0.40
codegen_flags: <defaults>
</compile_context>

<pallas_src>
import numpy as np
import jax
import jax.numpy as jnp
from jax.experimental import pallas as pl
from jax.experimental.pallas import tpu as pltpu

H = W = 16
SYM_SIZE = H * W  # 256 == self.symbols_size in the torch module


def _unifont_fused_kernel(idx_ref, sym_t_ref, w_t_ref, b_ref, out_ref):
    """One fused step: build E^T, gather TQ token columns, store lane-dense.

    idx_ref:   (1, TQ)   int32 token indices for this block (padded with 0).
    sym_t_ref: (256, N)  f32 glyph bitmaps, transposed, VMEM-resident.
    w_t_ref:   (dim, 256) f32 Linear weight, transposed, VMEM-resident.
    b_ref:     (dim, 1)  f32 Linear bias column, VMEM-resident.
    out_ref:   (dim, TQ) f32 output block (tokens on the 128-lane axis).
    """
    n = sym_t_ref.shape[1]
    tq = idx_ref.shape[1]

    # E^T = W^T @ symbols^T + b  -> (dim, N).  Recomputed per step: tiny, and
    # keeps the kernel correct under megacore sharding of the grid axis.
    e_t = (
        jnp.dot(w_t_ref[...], sym_t_ref[...], preferred_element_type=jnp.float32)
        + b_ref[...]
    )

    # one-hot^T: (N, TQ); column j has a single 1 at row QR[j].  0/1 values
    # make the MXU gather exact.
    row_iota = jax.lax.broadcasted_iota(jnp.int32, (n, tq), 0)
    one_hot_t = (row_iota == idx_ref[...]).astype(jnp.float32)

    # out^T = E^T @ one-hot^T -> (dim, TQ): full-lane (unmasked) stores.
    out_ref[...] = jnp.dot(
        e_t, one_hot_t, preferred_element_type=jnp.float32
    ).astype(out_ref.dtype)


def unifont_forward(QR, symbols_flat, weight, bias, *, tq=512):
    """QR: (B, L) int32 indices into the symbol table.
    symbols_flat: (N, 256) f32 glyph bitmaps (row 0 is the zero glyph).
    weight: (256, dim) f32 (W.T of the torch nn.Linear).
    bias: (dim,) f32."""
    B, L = QR.shape
    T = B * L
    N, S = symbols_flat.shape
    dim = weight.shape[1]

    # Lane-dense token-block size: multiple of 128; don't over-pad tiny T.
    tq = int(pl.cdiv(int(tq), 128)) * 128
    tq = max(128, min(tq, int(pl.cdiv(T, 128)) * 128))
    n_blocks = int(pl.cdiv(T, tq))
    t_pad = n_blocks * tq

    # Token ids as a single lane-dense row; pad with index 0 (zero glyph),
    # padded columns are sliced off below.
    qr_row = jnp.pad(QR.reshape(T).astype(jnp.int32), (0, t_pad - T)).reshape(1, t_pad)

    sym_t = symbols_flat.T                    # (256, N)
    w_t = weight.T                            # (dim, 256)
    b_col = bias.reshape(dim, 1)              # (dim, 1)

    out_t = pl.pallas_call(
        _unifont_fused_kernel,
        out_shape=jax.ShapeDtypeStruct((dim, t_pad), jnp.float32),
        grid=(n_blocks,),
        in_specs=[
            pl.BlockSpec((1, tq), lambda t: (0, t)),      # token ids, lane-dense
            pl.BlockSpec((S, N), lambda t: (0, 0)),       # symbols^T, resident
            pl.BlockSpec((dim, S), lambda t: (0, 0)),     # W^T, resident
            pl.BlockSpec((dim, 1), lambda t: (0, 0)),     # bias col, resident
        ],
        out_specs=pl.BlockSpec((dim, tq), lambda t: (0, t)),
        compiler_params=pltpu.CompilerParams(
            dimension_semantics=("parallel",)),            # megacore-friendly
    )(qr_row, sym_t, w_t, b_col)

    # Wrapper-side transpose back to (T, dim); pure layout plumbing.
    return out_t.T[:T].reshape(B, L, dim)


if __name__ == "__main__":
    key = jax.random.PRNGKey(0)

    # Small shapes consistent with the module's forward.
    charset = "abcdefgh"                     # sorted(set(charset)) -> 8 chars
    num_symbols = len(set(charset)) + 1      # +1: zero glyph inserted at idx 0
    dim = 32
    B, L = 2, 8

    k_sym, k_w, k_b, k_qr = jax.random.split(key, 4)

    # Deterministic synthetic binary 16x16 glyphs (stand-in for unifont.pickle).
    glyphs = (jax.random.uniform(k_sym, (num_symbols, SYM_SIZE)) > 0.5).astype(
        jnp.float32)
    glyphs = glyphs.at[0].set(0.0)           # symbols.insert(0, zeros_like(...))

    # Deterministic nn.Linear(256, dim) init (uniform +/- 1/sqrt(fan_in)).
    bound = 1.0 / np.sqrt(SYM_SIZE)
    weight = jax.random.uniform(
        k_w, (SYM_SIZE, dim), minval=-bound, maxval=bound).astype(jnp.float32)
    bias = jax.random.uniform(
        k_b, (dim,), minval=-bound, maxval=bound).astype(jnp.float32)

    QR = jax.random.randint(k_qr, (B, L), 0, num_symbols, dtype=jnp.int32)

    out = unifont_forward(QR, glyphs, weight, bias)
    out = jax.block_until_ready(out)

    # Pure-JAX reference: symbols[QR] -> flatten -> Linear.
    ref = jnp.take(glyphs, QR.reshape(-1), axis=0) @ weight + bias
    ref = ref.reshape(B, L, dim)

    assert out.shape == (B, L, dim)
    np.testing.assert_allclose(np.asarray(out), np.asarray(ref),
                               rtol=1e-5, atol=1e-5)
    print("KERNEL_OK")
</pallas_src>

<mosaic_0001>
module attributes {stable_mosaic.version = 11 : i64} {
  func.func @_unifont_fused_kernel(%arg0: i32, %arg1: memref<1x128xi32, #tpu.memory_space<vmem>>, %arg2: memref<256x9xf32, #tpu.memory_space<vmem>>, %arg3: memref<32x256xf32, #tpu.memory_space<vmem>>, %arg4: memref<32x1xf32, #tpu.memory_space<vmem>>, %arg5: memref<32x128xf32, #tpu.memory_space<vmem>>) attributes {dimension_semantics = [#tpu.dimension_semantics<parallel>], iteration_bounds = array<i64: 1>, scalar_prefetch = 0 : i64, scratch_operands = 0 : i64, tpu.core_type = #tpu.core_type<tc>, window_params = [{transform_indices = @transform_0, window_bounds = array<i64: 1, 128>}, {pipeline_mode = #tpu.pipeline_mode<synchronous>, transform_indices = @transform_1, window_bounds = array<i64: 256, 9>}, {pipeline_mode = #tpu.pipeline_mode<synchronous>, transform_indices = @transform_2, window_bounds = array<i64: 32, 256>}, {pipeline_mode = #tpu.pipeline_mode<synchronous>, transform_indices = @transform_3, window_bounds = array<i64: 32, 1>}, {transform_indices = @transform_4, window_bounds = array<i64: 32, 128>}]} {
    %c0 = arith.constant 0 : index
    %c0_0 = arith.constant 0 : index
    %0 = vector.load %arg3[%c0, %c0_0] : memref<32x256xf32, #tpu.memory_space<vmem>>, vector<32x256xf32>
    %c0_1 = arith.constant 0 : index
    %c0_2 = arith.constant 0 : index
    %1 = vector.load %arg2[%c0_1, %c0_2] : memref<256x9xf32, #tpu.memory_space<vmem>>, vector<256x9xf32>
    %cst = arith.constant dense<0.000000e+00> : vector<32x9xf32>
    %2 = tpu.matmul %0, %1, %cst {dimension_numbers = #tpu.dot_dimension_numbers<[1], [0], [0], [1], [0, 0, 1, 1], [], []>} : vector<32x256xf32>, vector<256x9xf32>, vector<32x9xf32> -> vector<32x9xf32>
    %c0_3 = arith.constant 0 : index
    %c0_4 = arith.constant 0 : index
    %3 = vector.load %arg4[%c0_3, %c0_4] : memref<32x1xf32, #tpu.memory_space<vmem>>, vector<32x1xf32>
    %4 = vector.broadcast %3 : vector<32x1xf32> to vector<32x9xf32>
    %5 = arith.addf %2, %4 : vector<32x9xf32>
    %6 = tpu.iota {dimensions = array<i32: 0>} : vector<9x128xi32>
    %c0_5 = arith.constant 0 : index
    %c0_6 = arith.constant 0 : index
    %7 = vector.load %arg1[%c0_5, %c0_6] : memref<1x128xi32, #tpu.memory_space<vmem>>, vector<1x128xi32>
    %8 = vector.broadcast %7 : vector<1x128xi32> to vector<9x128xi32>
    %9 = arith.cmpi eq, %6, %8 : vector<9x128xi32>
    %10 = arith.extui %9 : vector<9x128xi1> to vector<9x128xi32>
    %11 = arith.sitofp %10 : vector<9x128xi32> to vector<9x128xf32>
    %cst_7 = arith.constant dense<0.000000e+00> : vector<32x128xf32>
    %12 = tpu.matmul %5, %11, %cst_7 {dimension_numbers = #tpu.dot_dimension_numbers<[1], [0], [0], [1], [0, 0, 1, 1], [], []>} : vector<32x9xf32>, vector<9x128xf32>, vector<32x128xf32> -> vector<32x128xf32>
    %c0_8 = arith.constant 0 : index
    %c0_9 = arith.constant 0 : index
    %13 = vector.load %arg5[%c0_8, %c0_9] : memref<32x128xf32, #tpu.memory_space<vmem>>, vector<32x128xf32>
    tpu.vector_store %arg5[%c0_8, %c0_9], %12 {strides = array<i32>} : memref<32x128xf32, #tpu.memory_space<vmem>>, vector<32x128xf32>,
    return
  }
  func.func @transform_0(%arg0: i32) -> (i32, i32) {
    %c0_i32 = arith.constant 0 : i32
    %c0_i32_0 = arith.constant 0 : i32
    return %c0_i32, %arg0 : i32, i32
  }
  func.func @transform_1(%arg0: i32) -> (i32, i32) {
    %c0_i32 = arith.constant 0 : i32
    %c0_i32_0 = arith.constant 0 : i32
    %c0_i32_1 = arith.constant 0 : i32
    return %c0_i32, %c0_i32_0 : i32, i32
  }
  func.func @transform_2(%arg0: i32) -> (i32, i32) {
    %c0_i32 = arith.constant 0 : i32
    %c0_i32_0 = arith.constant 0 : i32
    %c0_i32_1 = arith.constant 0 : i32
    return %c0_i32, %c0_i32_0 : i32, i32
  }
  func.func @transform_3(%arg0: i32) -> (i32, i32) {
    %c0_i32 = arith.constant 0 : i32
    %c0_i32_0 = arith.constant 0 : i32
    %c0_i32_1 = arith.constant 0 : i32
    return %c0_i32, %c0_i32_0 : i32, i32
  }
  func.func @transform_4(%arg0: i32) -> (i32, i32) {
    %c0_i32 = arith.constant 0 : i32
    %c0_i32_0 = arith.constant 0 : i32
    return %c0_i32, %arg0 : i32, i32
  }
}

</mosaic_0001>

<bundles_post_ra>
// kernel: tpu_custom_call.1
= control target key start
LH: loop header
LB: loop body
LE: loop exit
PB: predicated region body
PF: predicated region fallthrough
CT: control target
= control target key end

     0   :  { %v458_v7 = vmov 0   ;;  %s640_s0 = inlined_call_operand.vmem [shape: s32[1,128], index: 0, kind: input, shape index: {}]   ;;  %s641_s1 = inlined_call_operand.vmem [shape: f32[256,9], index: 1, kind: input, shape index: {}]   ;;  %s642_s2 = inlined_call_operand.vmem [shape: f32[32,256], index: 2, kind: input, shape index: {}]   ;;  %s643_s3 = inlined_call_operand.vmem [shape: f32[32,1], index: 3, kind: input, shape index: {}]   ;;  %s644_s4 = inlined_call_operand.hbm [shape: f32[32,128], index: 4, kind: output, shape index: {}]  }
   0x1   :  { %v42_v0 = vld [vmem:[%s641_s1 + $0x80] sm:$0xff]  ;;  %v43_v1 = vld [vmem:[%s641_s1 + $0x88] sm:$0xff]  ;;  %v44_v5 = vld [vmem:[%s641_s1 + $0x90] sm:$0xff]  ;;  %432 = vset.pattern.permute.xlu0 %v458_v7  ;;  %433 = vset.pattern.permute.xlu1 %v458_v7 }
   0x2   :  { %v26_v2 = vld [vmem:[%s641_s1] sm:$0xff]  ;;  %v372_v3 = vpack.c.bf16 %v43_v1, %v42_v0  ;;  %v27_v4 = vld [vmem:[%s641_s1 + $0x8] sm:$0xff]  ;;  %v45_v6 = vld [vmem:[%s641_s1 + $0x98] sm:$0xff] }
   0x3   :  { %v374_v8 = vpack.c.bf16 %v27_v4, %v26_v2  ;;  %v376_v9 = vpack.c.bf16 %v45_v6, %v44_v5  ;;  %v28_v10 = vld [vmem:[%s641_s1 + $0x10] sm:$0xff]  ;;  %v29_v11 = vld [vmem:[%s641_s1 + $0x18] sm:$0xff]  ;;  %v46_v12 = vld [vmem:[%s641_s1 + $0xa0] sm:$0xff] }
   0x4   :  { %373 = vmatprep.subr.bf16.mxu0 %v372_v3  ;;  %410 = vmatprep.subr.bf16.mxu1 %v372_v3  ;;  %v47_v13 = vld [vmem:[%s641_s1 + $0xa8] sm:$0xff]  ;;  %v378_v14 = vpack.c.bf16 %v29_v11, %v28_v10  ;;  %v30_v16 = vld [vmem:[%s641_s1 + $0x20] sm:$0xff]  ;;  %v48_v18 = vld [vmem:[%s641_s1 + $0xb0] sm:$0xff] }
   0x5   :  { %375 = vmatpush3.bf16.msra.mxu0 %v374_v8  ;;  %418 = vmatpush3.bf16.msra.mxu1 %v374_v8  ;;  %v380_v15 = vpack.c.bf16 %v47_v13, %v46_v12  ;;  %v31_v17 = vld [vmem:[%s641_s1 + $0x28] sm:$0xff]  ;;  %v49_v19 = vld [vmem:[%s641_s1 + $0xb8] sm:$0xff]  ;;  %v32_v22 = vld [vmem:[%s641_s1 + $0x30] sm:$0xff] }
   0x6   :  { %377 = vmatprep.subr.bf16.mxu0 %v376_v9  ;;  %411 = vmatprep.subr.bf16.mxu1 %v376_v9  ;;  %v382_v20 = vpack.c.bf16 %v31_v17, %v30_v16  ;;  %v384_v21 = vpack.c.bf16 %v49_v19, %v48_v18  ;;  %v33_v23 = vld [vmem:[%s641_s1 + $0x38] sm:$0xff]  ;;  %v50_v24 = vld [vmem:[%s641_s1 + $0xc0] sm:$0xff]  ;;  %v51_v25 = vld [vmem:[%s641_s1 + $0xc8] sm:$0xff] }
   0x7   :  { %v19_v26 = vld [vmem:[%s642_s2 + $0x8] sm:$0xff]  ;;  %v386_v27 = vpack.c.bf16 %v33_v23, %v32_v22  ;;  %v34_v28 = vld [vmem:[%s641_s1 + $0x40] sm:$0xff]  ;;  %v25_v29 = vld [vmem:[%s642_s2 + $0x38] sm:$0xff]  ;;  %v388_v30 = vpack.c.bf16 %v51_v25, %v50_v24 }
   0x8   :  { %146 = vmatprep.mubr.f32.mxu0 %v19_v26  ;;  %v35_v31 = vld [vmem:[%s641_s1 + $0x48] sm:$0xff]  ;;  %v58_v32 = vld [vmem:[%s643_s3] sm:$0xff]  ;;  %v60_v33 = vld [vmem:[%s643_s3 + $0x10] sm:$0xff]  ;;  %161 = vmatprep.mubr.f32.mxu1 %v25_v29 }
   0x9   :  { %379 = vmatpush3.bf16.msra.mxu0 %v378_v14  ;;  %419 = vmatpush3.bf16.msra.mxu1 %v378_v14  ;;  %v52_v34 = vld [vmem:[%s641_s1 + $0xd0] sm:$0xff]  ;;  %v53_v35 = vld [vmem:[%s641_s1 + $0xd8] sm:$0xff] }
   0xa   :  { %381 = vmatprep.subr.bf16.mxu0 %v380_v15  ;;  %412 = vmatprep.subr.bf16.mxu1 %v380_v15 }
   0xb   :  { %64 = vperm.xlu0 %432, %v58_v32  }
   0xd   :  { %383 = vmatpush3.bf16.msra.mxu0 %v382_v20  ;;  %420 = vmatpush3.bf16.msra.mxu1 %v382_v20 }
   0xe   :  { %385 = vmatprep.subr.bf16.mxu0 %v384_v21  ;;  %413 = vmatprep.subr.bf16.mxu1 %v384_v21 }
   0xf   :  { %9 = vsyncpa [#allocation3], 0  ;;  %74 = vperm.xlu1 %433, %v60_v33   ;;  %v59_v36 = vld [vmem:[%s643_s3 + $0x8] sm:$0xff]  ;;  %v390_v37 = vpack.c.bf16 %v35_v31, %v34_v28  ;;  %v61_v38 = vld [vmem:[%s643_s3 + $0x18] sm:$0xff]  ;;  %v392_v39 = vpack.c.bf16 %v53_v35, %v52_v34  ;;  %v167_v61 = vlaneseq  ;;  %v459_v1 = vmov 0.0  }
  0x10   :  { %v36_v40 = vld [vmem:[%s641_s1 + $0x50] sm:$0xff]  ;;  %v37_v41 = vld [vmem:[%s641_s1 + $0x58] sm:$0xff]  ;;  %v54_v42 = vld [vmem:[%s641_s1 + $0xe0] sm:$0xff]  ;;  %69 = vperm.xlu0 %432, %v59_v36   ;;  %vm194_vm2 = vcmask 1040384   ;;  %v460_v3 = vmov 1.0   ;;  %vm181_vm4 = vcmask 72704  }
  0x11   :  { %387 = vmatpush3.bf16.msra.mxu0 %v386_v27  ;;  %421 = vmatpush3.bf16.msra.mxu1 %v386_v27  ;;  %v55_v43 = vld [vmem:[%s641_s1 + $0xe8] sm:$0xff]  ;;  %v394_v44 = vpack.c.bf16 %v37_v41, %v36_v40  ;;  %v38_v46 = vld [vmem:[%s641_s1 + $0x60] sm:$0xff]  ;;  %v56_v48 = vld [vmem:[%s641_s1 + $0xf0] sm:$0xff]  ;;  %v168_v62 = vshrl.u32 %v167_v61, 7 }
  0x12   :  { %389 = vmatprep.subr.bf16.mxu0 %v388_v30  ;;  %414 = vmatprep.subr.bf16.mxu1 %v388_v30  ;;  %v396_v45 = vpack.c.bf16 %v55_v43, %v54_v42  ;;  %v39_v47 = vld [vmem:[%s641_s1 + $0x68] sm:$0xff]  ;;  %v57_v49 = vld [vmem:[%s641_s1 + $0xf8] sm:$0xff]  ;;  %v40_v52 = vld [vmem:[%s641_s1 + $0x70] sm:$0xff] }
  0x13   :  { %79 = vperm.xlu1 %433, %v61_v38   ;;  %v398_v50 = vpack.c.bf16 %v39_v47, %v38_v46  ;;  %v400_v51 = vpack.c.bf16 %v57_v49, %v56_v48  ;;  %v41_v53 = vld [vmem:[%s641_s1 + $0x78] sm:$0xff]  ;;  %v18_v55 = vld [vmem:[%s642_s2] sm:$0xff]  ;;  %v24_v56 = vld [vmem:[%s642_s2 + $0x30] sm:$0xff]  ;;  %v169_v63 = vadd.s32 8, %v168_v62 }
  0x14   :  { %v402_v54 = vpack.c.bf16 %v41_v53, %v40_v52  ;;  %v21_v57 = vld [vmem:[%s642_s2 + $0x18] sm:$0xff]  ;;  %v20_v58 = vld [vmem:[%s642_s2 + $0x10] sm:$0xff]  ;;  %v23_v59 = vld [vmem:[%s642_s2 + $0x28] sm:$0xff] }
  0x15   :  { %391 = vmatpush3.bf16.msra.mxu0 %v390_v37  ;;  %422 = vmatpush3.bf16.msra.mxu1 %v390_v37  ;;  %v22_v60 = vld [vmem:[%s642_s2 + $0x20] sm:$0xff] }
  0x16   :  { %393 = vmatprep.subr.bf16.mxu0 %v392_v39  ;;  %415 = vmatprep.subr.bf16.mxu1 %v392_v39  ;;  %v303_v0 = vld [vmem:[%s640_s0] ss:$0 sm:$0xff]  ;;  %s461_s0 = smov [#allocation2]  }
  0x17   :  { %vm176_vm0 = vcmp.eq.s32.totalorder %v169_v63, %v303_v0  ;;  %vm175_vm1 = vcmp.eq.s32.totalorder %v168_v62, %v303_v0  ;;  %s292_s2 = sshll.u32 %s461_s0, 4  ;;  %s293_s2 = int_to_ptr.vmem [resolvable:$true] %s292_s2 }
  0x18   :  { %v305_v2 = vsel %vm176_vm0, 1.0, %v459_v1  ;;  %vm405_vm3 = vmpackc.low %vm194_vm2, %vm175_vm1  ;;  %s434_s25 = scalar_lea.vmem %s293_s2, 512  ;;  %p439_p1 = scmp.lt.s32.totalorder %s293_s2, %s293_s2 }
  0x19   :  { %395 = vmatpush3.bf16.msra.mxu0 %v394_v44  ;;  %423 = vmatpush3.bf16.msra.mxu1 %v394_v44  ;;  %v404_v4 = vpack.c.bf16 %v305_v2, %v460_v3  ;;  %p435_p0 = scmp.ne.s32.totalorder %s293_s2, %s434_s25  ;;  %p440_p2 = scmp.lt.s32.totalorder %s434_s25, %s434_s25 }
  0x1a   :  { %397 = vmatprep.subr.bf16.mxu0 %v396_v45  ;;  %416 = vmatprep.subr.bf16.mxu1 %v396_v45 }
  0x1b   :  { %p441_p3 = por %p440_p2, %p439_p1 }
  0x1d   :  { %399 = vmatpush3.bf16.msra.mxu0 %v398_v50  ;;  %424 = vmatpush3.bf16.msra.mxu1 %v398_v50  ;;  %p442_p4 = pnand %p441_p3, %p435_p0 }
  0x1e   :  { %401 = vmatprep.subr.bf16.mxu0 %v400_v51  ;;  %417 = vmatprep.subr.bf16.mxu1 %v400_v51 }
  0x21   :  { %403 = vmatpush3.bf16.msra.mxu0 %v402_v54  ;;  %425 = vmatpush3.bf16.msra.mxu1 %v402_v54 }
  0x22   :  { %406 = vmatprep.subr.msk.bf16.mxu1 %vm405_vm3, %v404_v4 }
  0x24   :  { %147 = vmatmul.mubr.f32.vlgmr.msra.gmra.mrb[0].mxu0 %v18_v55  ;;  %162 = vmatmul.mubr.f32.vlgmr.msra.gmra.mrb[0].mxu1 %v24_v56 }
  0x25   :  { %151 = vmatprep.mubr.f32.mxu0 %v21_v57  ;;  %409 = vmatpush3.bf16.msk.msra.mxu1 %vm405_vm3, %v404_v4 }
  0x28   :  { %152 = vmatmul.mubr.f32.gmra.mrb[2].mxu0 %v20_v58 }
  0x29   :  { %156 = vmatprep.mubr.f32.mxu0 %v23_v59 }
  0x2c   :  { %157 = vmatmul.mubr.f32.gmra.mrb[4].mxu0 %v22_v60 }
  0x8a   :  { %v65_v5 = vpop.permute.xlu0 %64 }
  0x8e   :  { %v75_v13 = vpop.permute.xlu1 %74 }
  0x8f   :  { %v70_v17 = vpop.permute.xlu0 %69 }
  0x92   :  { %v80_v21 = vpop.permute.xlu1 %79 }
  0xf7   :  { %v344_v6 = vpop.f32.mrb[0].mxu0  ;;  %v353_v7 = vpop.f32.mrb[0].mxu1 }
  0xf8   :  { %v345_v8 = vpop.f32.mrb[1].mxu0  ;;  %v354_v9 = vpop.f32.mrb[1].mxu1 }
  0xf9   :  { %v346_v10 = vadd.f32 %v345_v8, %v344_v6  ;;  %v355_v11 = vadd.f32 %v354_v9, %v353_v7 }
  0xfb   :  { %v149_v12 = vadd.f32 %v346_v10, %v65_v5  ;;  %v347_v14 = vpop.f32.mrb[2].mxu0  ;;  %v164_v24 = vadd.f32 %v355_v11, %v80_v21 }
  0xfc   :  { %v348_v15 = vpop.f32.mrb[3].mxu0 }
  0xfd   :  { %v349_v16 = vadd.f32 %v348_v15, %v347_v14  ;;  %366 = vmatprep.mubr.msk.f32.mxu1 %vm181_vm4, %v149_v12 }
  0xff   :  { %v154_v18 = vadd.f32 %v349_v16, %v70_v17  ;;  %v350_v19 = vpop.f32.mrb[4].mxu0 }
 0x100   :  { %v351_v20 = vpop.f32.mrb[5].mxu0 }
 0x101   :  { %v352_v22 = vadd.f32 %v351_v20, %v350_v19  ;;  %367 = vmatmul.mubr.msk.f32.vlgmr.msra.gmra.mrb[2].mxu1 %vm181_vm4, %v154_v18 }
 0x103   :  { %v159_v23 = vadd.f32 %v352_v22, %v75_v13 }
 0x105   :  { %369 = vmatprep.mubr.msk.f32.mxu1 %vm181_vm4, %v159_v23 }
 0x106   :  { %370 = vmatmul.mubr.msk.f32.gmra.mrb[4].mxu1 %vm181_vm4, %v164_v24 }
 0x1d4   :  { %v368_v25 = vpop.f32.mrb[2].mxu1 }
 0x1d5   :  { %284 = vst [vmem:[#allocation2 + $0x8] sm:$0xff] %v368_v25  ;;  %v264_v26 = vpop.f32.mrb[3].mxu1 }
 0x1d6   :  { %283 = vst [vmem:[#allocation2] sm:$0xff] %v264_v26 }
 0x1d9   :  { %v371_v27 = vpop.f32.mrb[4].mxu1 }
 0x1da   :  { %286 = vst [vmem:[#allocation2 + $0x18] sm:$0xff] %v371_v27  ;;  %v274_v28 = vpop.f32.mrb[5].mxu1 }
 0x1db   :  { %285 = vst [vmem:[#allocation2 + $0x10] sm:$0xff] %v274_v28 }
 0x1dc   :  { %445 = shalt.err (!%p442_p4)
}
 0x1dd   :  { %s446_s27 = scalar_lea.hbm %s644_s4, 512 }
 0x1de   :  { %p447_p5 = scmp.ne.s32.totalorder %s644_s4, %s446_s27  ;;  %p450_p6 = scmp.lt.u32.totalorder %s446_s27, %s644_s4 }
 0x1e0   :  { %p452_p7 = pnand %p450_p6, %p447_p5 }
 0x1e2   :  { %455 = shalt.err (!%p452_p7)
}
 0x1e3   :  { %s462_s6 = smov 128   ;;  %s463_s7 = smov 8  }
 0x1e4   :  { %298 = dma.vmem_to_hbm [thread:$0]  %s293_s2, 512, %s644_s4, [#allocation3], %s462_s6, %s462_s6, %s463_s7  }
 0x1e5   :  { %456 = dma.done.wait [#allocation3], 512  }
 0x1e6   :  { %457 = vsyncadd [#allocation3], 4294966784 }
 0x1e7   :  { %302 = vsyncpa [#allocation3], 1 }

</bundles_post_ra>
